<compile_context>
chip_gen: v7x
topology: tpu7x:2x2x1
jax: 0.10.0
libtpu: 0.0.40
codegen_flags: <defaults>
</compile_context>

<pallas_src>
import jax
import jax.numpy as jnp
from jax.experimental import pallas as pl
from jax.experimental.pallas import tpu as pltpu


def _round_up(x, m):
    return (x + m - 1) // m * m


def make_pose_optim_kernel(bias_layout, nf, rf):
    """bias_layout: ((off, size), ...) static lane offsets into the packed bias row.

    nf = num_neighbors * 2 * dim (flattened feature width)
    rf = round_up(nf, 128)       (lane boundary between the R and P halves of rp_ref)
    """
    (o1, s1), (o2, s2), (o3, s3), (o4, s4) = bias_layout

    def kernel(flat_ref, w1_ref, w2_ref, w3_ref, w4_ref,
               b_ref, s_ref, rp_ref, out_ref):

        def linear(h_bf16, w_ref, off, size):
            y = jnp.dot(h_bf16, w_ref[...],
                        preferred_element_type=jnp.float32)      # bf16 x bf16 -> f32 acc
            return y + b_ref[:, off:off + size]                  # (1, size) f32 bias bcast

        # In-kernel bf16 cast of the streamed f32 activations (no wrapper cast pass).
        flat_q = flat_ref[...].astype(jnp.bfloat16)              # (tm, nf) bf16

        # MLP: cast to bf16 right at the ReLU so interlayer vst/vld bytes are halved.
        h = jnp.maximum(linear(flat_q, w1_ref, o1, s1), 0.0).astype(jnp.bfloat16)
        h = jnp.maximum(linear(h, w2_ref, o2, s2), 0.0).astype(jnp.bfloat16)
        h = jnp.maximum(linear(h, w3_ref, o3, s3), 0.0).astype(jnp.bfloat16)
        logits = linear(h, w4_ref, o4, s4)                       # (tm, N) f32

        # Softmax over the neighbor axis (EUP exp + approx reciprocal).
        m = jnp.max(logits, axis=-1, keepdims=True)
        e = jnp.exp(logits - m)
        wts = e * pl.reciprocal(jnp.sum(e, axis=-1, keepdims=True), approx=True)

        # Weighted pooling kept strictly 2-D via constant 0/1 matrices, now one merged
        # bf16 K=N matmul against [R | P]:
        #   lanes [0, rf)          : each neighbor weight replicated over its 2D lanes,
        #   lanes [rf, rf + out_w) : softmax weights placed in output lanes [2D, 2D+N).
        rp = jnp.dot(wts.astype(jnp.bfloat16), rp_ref[...],
                     preferred_element_type=jnp.float32)         # (tm, rf + out_w) f32
        w_rep = rp[:, :nf]                                       # (tm, nf) f32
        lhs = (flat_q.astype(jnp.float32) * w_rep).astype(jnp.bfloat16)
        out = jnp.dot(lhs, s_ref[...],                           # fold strided feature
                      preferred_element_type=jnp.float32)        # groups into [0, 2D)
        out_ref[...] = out + rp[:, rf:]                          # dense (tm, 128) store

    return kernel


def pack_pose_optim_params(params):
    """Precompute the VMEM-resident kernel operands from (in, out)-layout f32 params."""
    (w1, b1), (w2, b2), (w3, b3), (w4, b4) = params
    nf = w1.shape[0]              # num_neighbors * 2 * dim
    n = w4.shape[1]               # num_neighbors
    d2 = nf // n                  # 2 * dim
    out_w = _round_up(d2 + n, 128)
    rf = _round_up(nf, 128)

    # bf16 weights: MXU-native input format, half the resident VMEM / HBM traffic.
    weights = tuple(w.astype(jnp.bfloat16) for w in (w1, w2, w3, w4))

    # Single packed bias row (f32), every segment start 128-lane aligned.
    segs, layout, off = [], [], 0
    for b in (b1, b2, b3, b4):
        k = b.shape[-1]
        layout.append((off, k))
        segs.append(b.astype(jnp.float32).reshape(1, k))
        pad = (-k) % 128
        if pad:
            segs.append(jnp.zeros((1, pad), jnp.float32))
        off += k + pad
    b_packed = jnp.concatenate(segs, axis=-1)

    # Constant 0/1 matrices (exact in bf16) for pooling / lane-dense output packing.
    kk = jnp.arange(n)[:, None]
    jr = jnp.arange(rf)[None, :]
    r_mat = ((jr < nf) & (jr // d2 == kk)).astype(jnp.bfloat16)                  # (n, rf)
    p_mat = (kk + d2 == jnp.arange(out_w)[None, :]).astype(jnp.bfloat16)         # (n, out_w)
    rp_mat = jnp.concatenate([r_mat, p_mat], axis=-1)                            # (n, rf+out_w)
    s_mat = (jnp.arange(nf)[:, None] % d2 ==
             jnp.arange(out_w)[None, :]).astype(jnp.bfloat16)                    # (nf, out_w)

    return dict(n=n, d2=d2, nf=nf, rf=rf, out_w=out_w, weights=weights,
                b_packed=b_packed, bias_layout=tuple(layout),
                rp_mat=rp_mat, s_mat=s_mat)


def pose_optim_forward_batched(x_batch, packed, *, block_m=512):
    """x_batch: (B, N, 2*dim) f32 -> (pooled (B, 2*dim) f32, weights (B, N) f32)."""
    bsz, n, d2 = x_batch.shape
    assert n == packed["n"] and d2 == packed["d2"]
    nf, rf, out_w = packed["nf"], packed["rf"], packed["out_w"]

    # M-tile selection:
    #   * large tiles amortize per-step overhead (128->512 ~= 29%->85% of roofline),
    #   * keep >= 2 grid steps when the batch allows so v7x's 2 TCs both run,
    #   * cap at 1024 so footprint stays inside v5e's 16 MiB scoped-VMEM default.
    bp8 = _round_up(max(bsz, 8), 8)
    cap = min(block_m, 1024)
    steps = -(-bp8 // cap)
    if bp8 >= 16:
        steps = max(steps, 2)
    tm = _round_up(-(-bp8 // steps), 8)
    bp = _round_up(bp8, tm)

    # f32 activations go straight in; bf16 cast happens inside the kernel.
    flat = x_batch.reshape(bsz, nf)
    if bp != bsz:
        flat = jnp.pad(flat, ((0, bp - bsz), (0, 0)))

    w1, w2, w3, w4 = packed["weights"]
    kernel = make_pose_optim_kernel(packed["bias_layout"], nf, rf)

    def resident(arr):
        # Whole array, same block every step -> DMA'd once, stays in VMEM.
        # (pipeline_mode=pl.Buffered(1) would save ~1 MiB of dead second buffers;
        #  skipped as it only matters at extreme tm on v5e.)
        return pl.BlockSpec(arr.shape, lambda i: (0, 0))

    packed_out = pl.pallas_call(
        kernel,
        out_shape=jax.ShapeDtypeStruct((bp, out_w), jnp.float32),
        grid_spec=pltpu.PrefetchScalarGridSpec(
            num_scalar_prefetch=0,
            grid=(bp // tm,),
            in_specs=[
                pl.BlockSpec((tm, nf), lambda i: (i, 0)),   # streamed activations
                resident(w1), resident(w2), resident(w3), resident(w4),
                resident(packed["b_packed"]),
                resident(packed["s_mat"]),
                resident(packed["rp_mat"]),
            ],
            out_specs=pl.BlockSpec((tm, out_w), lambda i: (i, 0)),
        ),
        compiler_params=pltpu.CompilerParams(
            dimension_semantics=("parallel",)),   # megacore sharding on v7x
    )(flat, w1, w2, w3, w4, packed["b_packed"], packed["s_mat"], packed["rp_mat"])

    pooled = packed_out[:bsz, :d2]
    weights = packed_out[:bsz, d2:d2 + n]
    return pooled, weights


def pose_optim_forward(ref_latent, packed):
    """Matches PoseOptim.forward: (N, 2*dim) -> (pooled (1, 2*dim), weights (N, 1))."""
    pooled, w = pose_optim_forward_batched(ref_latent[None], packed)
    return pooled, w[0][:, None]


def init_params(key, num_neighbors, dim):
    """Deterministic xavier-uniform init; weights stored as (in, out)."""
    dim2 = dim * 2
    sizes = [
        (num_neighbors * dim2, num_neighbors * 64),
        (num_neighbors * 64, num_neighbors * 32),
        (num_neighbors * 32, num_neighbors * 16),
        (num_neighbors * 16, num_neighbors),
    ]
    params = []
    for (fan_in, fan_out) in sizes:
        key, wk = jax.random.split(key)
        bound = (6.0 / (fan_in + fan_out)) ** 0.5
        w = jax.random.uniform(wk, (fan_in, fan_out), jnp.float32, -bound, bound)
        b = jnp.zeros((1, fan_out), jnp.float32)
        params.append((w, b))
    return params


def reference_forward_batched(x_batch, params):
    """Pure-JAX reference mirroring the kernel numerics (bf16 dot inputs, f32 acc,
    bf16-quantized softmax weights in the pooling path)."""
    bsz, n, d2 = x_batch.shape
    flat = x_batch.reshape(bsz, n * d2)
    h = flat
    for i, (w, b) in enumerate(params):
        y = jnp.dot(h.astype(jnp.bfloat16), w.astype(jnp.bfloat16),
                    preferred_element_type=jnp.float32) + b
        h = jnp.maximum(y, 0.0) if i < len(params) - 1 else y
    wts = jax.nn.softmax(h, axis=-1)                                   # (B, N) f32
    x_q = flat.astype(jnp.bfloat16).astype(jnp.float32).reshape(bsz, n, d2)
    w_q = wts.astype(jnp.bfloat16).astype(jnp.float32)
    pooled = jnp.einsum("bn,bnd->bd", w_q, x_q, precision="highest")
    return pooled, wts


if __name__ == "__main__":
    num_neighbors = 8
    dim = 16            # module uses dim*2 internally -> feature width 32
    d2 = dim * 2

    key = jax.random.PRNGKey(0)
    key, xk, bk = jax.random.split(key, 3)

    params = init_params(key, num_neighbors, dim)
    packed = pack_pose_optim_params(params)

    # --- single-sample path (exact PyTorch module semantics) ---
    ref_latent = jax.random.normal(xk, (num_neighbors, d2), jnp.float32)
    pooled1, weights1 = pose_optim_forward(ref_latent, packed)
    jax.block_until_ready((pooled1, weights1))
    assert pooled1.shape == (1, d2)
    assert weights1.shape == (num_neighbors, 1)

    ref_p1, ref_w1 = reference_forward_batched(ref_latent[None], params)
    assert jnp.allclose(pooled1, ref_p1, atol=1e-2, rtol=1e-2)
    assert jnp.allclose(weights1[:, 0], ref_w1[0], atol=1e-2, rtol=1e-2)

    # --- batched path (grid splits into >= 2 "parallel" steps; weights resident) ---
    batch = 256
    x_batch = jax.random.normal(bk, (batch, num_neighbors, d2), jnp.float32)
    pooled_b, weights_b = pose_optim_forward_batched(x_batch, packed)
    jax.block_until_ready((pooled_b, weights_b))

    ref_pb, ref_wb = reference_forward_batched(x_batch, params)
    assert pooled_b.shape == (batch, d2)
    assert weights_b.shape == (batch, num_neighbors)
    assert jnp.allclose(pooled_b, ref_pb, atol=1e-2, rtol=1e-2)
    assert jnp.allclose(weights_b, ref_wb, atol=1e-2, rtol=1e-2)

    print("KERNEL_OK")
</pallas_src>

<mosaic_0001>
module attributes {stable_mosaic.version = 11 : i64} {
  func.func @kernel(%arg0: i32, %arg1: memref<8x256xf32, #tpu.memory_space<vmem>>, %arg2: memref<256x512xbf16, #tpu.memory_space<vmem>>, %arg3: memref<512x256xbf16, #tpu.memory_space<vmem>>, %arg4: memref<256x128xbf16, #tpu.memory_space<vmem>>, %arg5: memref<128x8xbf16, #tpu.memory_space<vmem>>, %arg6: memref<1x1024xf32, #tpu.memory_space<vmem>>, %arg7: memref<256x128xbf16, #tpu.memory_space<vmem>>, %arg8: memref<8x384xbf16, #tpu.memory_space<vmem>>, %arg9: memref<8x128xf32, #tpu.memory_space<vmem>>) attributes {dimension_semantics = [#tpu.dimension_semantics<parallel>], iteration_bounds = array<i64: 1>, scalar_prefetch = 0 : i64, scratch_operands = 0 : i64, tpu.core_type = #tpu.core_type<tc>, window_params = [{transform_indices = @transform_0, window_bounds = array<i64: 8, 256>}, {pipeline_mode = #tpu.pipeline_mode<synchronous>, transform_indices = @transform_1, window_bounds = array<i64: 256, 512>}, {pipeline_mode = #tpu.pipeline_mode<synchronous>, transform_indices = @transform_2, window_bounds = array<i64: 512, 256>}, {pipeline_mode = #tpu.pipeline_mode<synchronous>, transform_indices = @transform_3, window_bounds = array<i64: 256, 128>}, {pipeline_mode = #tpu.pipeline_mode<synchronous>, transform_indices = @transform_4, window_bounds = array<i64: 128, 8>}, {pipeline_mode = #tpu.pipeline_mode<synchronous>, transform_indices = @transform_5, window_bounds = array<i64: 1, 1024>}, {pipeline_mode = #tpu.pipeline_mode<synchronous>, transform_indices = @transform_6, window_bounds = array<i64: 256, 128>}, {pipeline_mode = #tpu.pipeline_mode<synchronous>, transform_indices = @transform_7, window_bounds = array<i64: 8, 384>}, {transform_indices = @transform_8, window_bounds = array<i64: 8, 128>}]} {
    %c0 = arith.constant 0 : index
    %c0_0 = arith.constant 0 : index
    %0 = vector.load %arg1[%c0, %c0_0] : memref<8x256xf32, #tpu.memory_space<vmem>>, vector<8x256xf32>
    %1 = arith.truncf %0 : vector<8x256xf32> to vector<8x256xbf16>
    %c0_1 = arith.constant 0 : index
    %c0_2 = arith.constant 0 : index
    %2 = vector.load %arg2[%c0_1, %c0_2] : memref<256x512xbf16, #tpu.memory_space<vmem>>, vector<256x512xbf16>
    %cst = arith.constant dense<0.000000e+00> : vector<8x512xf32>
    %3 = tpu.matmul %1, %2, %cst {dimension_numbers = #tpu.dot_dimension_numbers<[1], [0], [0], [1], [0, 0, 1, 1], [], []>} : vector<8x256xbf16>, vector<256x512xbf16>, vector<8x512xf32> -> vector<8x512xf32>
    %c0_3 = arith.constant 0 : index
    %c0_4 = arith.constant 0 : index
    %4 = vector.load %arg6[%c0_3, %c0_4] : memref<1x1024xf32, #tpu.memory_space<vmem>>, vector<1x512xf32>
    %5 = vector.broadcast %4 : vector<1x512xf32> to vector<8x512xf32>
    %6 = arith.addf %3, %5 : vector<8x512xf32>
    %cst_5 = arith.constant 0.000000e+00 : f32
    %7 = vector.broadcast %cst_5 : f32 to vector<8x512xf32>
    %8 = arith.maximumf %6, %7 : vector<8x512xf32>
    %9 = arith.truncf %8 : vector<8x512xf32> to vector<8x512xbf16>
    %c0_6 = arith.constant 0 : index
    %c0_7 = arith.constant 0 : index
    %10 = vector.load %arg3[%c0_6, %c0_7] : memref<512x256xbf16, #tpu.memory_space<vmem>>, vector<512x256xbf16>
    %cst_8 = arith.constant dense<0.000000e+00> : vector<8x256xf32>
    %11 = tpu.matmul %9, %10, %cst_8 {dimension_numbers = #tpu.dot_dimension_numbers<[1], [0], [0], [1], [0, 0, 1, 1], [], []>} : vector<8x512xbf16>, vector<512x256xbf16>, vector<8x256xf32> -> vector<8x256xf32>
    %c0_9 = arith.constant 0 : index
    %c512 = arith.constant 512 : index
    %12 = vector.load %arg6[%c0_9, %c512] : memref<1x1024xf32, #tpu.memory_space<vmem>>, vector<1x256xf32>
    %13 = vector.broadcast %12 : vector<1x256xf32> to vector<8x256xf32>
    %14 = arith.addf %11, %13 : vector<8x256xf32>
    %cst_10 = arith.constant 0.000000e+00 : f32
    %15 = vector.broadcast %cst_10 : f32 to vector<8x256xf32>
    %16 = arith.maximumf %14, %15 : vector<8x256xf32>
    %17 = arith.truncf %16 : vector<8x256xf32> to vector<8x256xbf16>
    %c0_11 = arith.constant 0 : index
    %c0_12 = arith.constant 0 : index
    %18 = vector.load %arg4[%c0_11, %c0_12] : memref<256x128xbf16, #tpu.memory_space<vmem>>, vector<256x128xbf16>
    %cst_13 = arith.constant dense<0.000000e+00> : vector<8x128xf32>
    %19 = tpu.matmul %17, %18, %cst_13 {dimension_numbers = #tpu.dot_dimension_numbers<[1], [0], [0], [1], [0, 0, 1, 1], [], []>} : vector<8x256xbf16>, vector<256x128xbf16>, vector<8x128xf32> -> vector<8x128xf32>
    %c0_14 = arith.constant 0 : index
    %c768 = arith.constant 768 : index
    %20 = vector.load %arg6[%c0_14, %c768] : memref<1x1024xf32, #tpu.memory_space<vmem>>, vector<1x128xf32>
    %21 = vector.broadcast %20 : vector<1x128xf32> to vector<8x128xf32>
    %22 = arith.addf %19, %21 : vector<8x128xf32>
    %cst_15 = arith.constant 0.000000e+00 : f32
    %23 = vector.broadcast %cst_15 : f32 to vector<8x128xf32>
    %24 = arith.maximumf %22, %23 : vector<8x128xf32>
    %25 = arith.truncf %24 : vector<8x128xf32> to vector<8x128xbf16>
    %c0_16 = arith.constant 0 : index
    %c0_17 = arith.constant 0 : index
    %26 = vector.load %arg5[%c0_16, %c0_17] : memref<128x8xbf16, #tpu.memory_space<vmem>>, vector<128x8xbf16>
    %cst_18 = arith.constant dense<0.000000e+00> : vector<8x8xf32>
    %27 = tpu.matmul %25, %26, %cst_18 {dimension_numbers = #tpu.dot_dimension_numbers<[1], [0], [0], [1], [0, 0, 1, 1], [], []>} : vector<8x128xbf16>, vector<128x8xbf16>, vector<8x8xf32> -> vector<8x8xf32>
    %c0_19 = arith.constant 0 : index
    %c896 = arith.constant 896 : index
    %28 = vector.load %arg6[%c0_19, %c896] : memref<1x1024xf32, #tpu.memory_space<vmem>>, vector<1x8xf32>
    %29 = vector.broadcast %28 : vector<1x8xf32> to vector<8x8xf32>
    %30 = arith.addf %27, %29 : vector<8x8xf32>
    %cst_20 = arith.constant dense<0xFF800000> : vector<8xf32>
    %31 = vector.multi_reduction <maximumf>, %30, %cst_20 [1] : vector<8x8xf32> to vector<8xf32>
    %32 = vector.shape_cast %31 : vector<8xf32> to vector<8x1xf32>
    %33 = vector.broadcast %32 : vector<8x1xf32> to vector<8x8xf32>
    %34 = arith.subf %30, %33 : vector<8x8xf32>
    %35 = math.exp %34 : vector<8x8xf32>
    %cst_21 = arith.constant dense<0.000000e+00> : vector<8xf32>
    %36 = vector.multi_reduction <add>, %35, %cst_21 [1] : vector<8x8xf32> to vector<8xf32>
    %37 = vector.shape_cast %36 : vector<8xf32> to vector<8x1xf32>
    %38 = tpu.reciprocal %37 {approx = true} : vector<8x1xf32> -> vector<8x1xf32>
    %39 = vector.broadcast %38 : vector<8x1xf32> to vector<8x8xf32>
    %40 = arith.mulf %35, %39 : vector<8x8xf32>
    %41 = arith.truncf %40 : vector<8x8xf32> to vector<8x8xbf16>
    %c0_22 = arith.constant 0 : index
    %c0_23 = arith.constant 0 : index
    %42 = vector.load %arg8[%c0_22, %c0_23] : memref<8x384xbf16, #tpu.memory_space<vmem>>, vector<8x384xbf16>
    %cst_24 = arith.constant dense<0.000000e+00> : vector<8x384xf32>
    %43 = tpu.matmul %41, %42, %cst_24 {dimension_numbers = #tpu.dot_dimension_numbers<[1], [0], [0], [1], [0, 0, 1, 1], [], []>} : vector<8x8xbf16>, vector<8x384xbf16>, vector<8x384xf32> -> vector<8x384xf32>
    %44 = vector.extract_strided_slice %43 {offsets = [0, 0], sizes = [8, 256], strides = [1, 1]} : vector<8x384xf32> to vector<8x256xf32>
    %45 = arith.extf %1 : vector<8x256xbf16> to vector<8x256xf32>
    %46 = arith.mulf %45, %44 : vector<8x256xf32>
    %47 = arith.truncf %46 : vector<8x256xf32> to vector<8x256xbf16>
    %c0_25 = arith.constant 0 : index
    %c0_26 = arith.constant 0 : index
    %48 = vector.load %arg7[%c0_25, %c0_26] : memref<256x128xbf16, #tpu.memory_space<vmem>>, vector<256x128xbf16>
    %cst_27 = arith.constant dense<0.000000e+00> : vector<8x128xf32>
    %49 = tpu.matmul %47, %48, %cst_27 {dimension_numbers = #tpu.dot_dimension_numbers<[1], [0], [0], [1], [0, 0, 1, 1], [], []>} : vector<8x256xbf16>, vector<256x128xbf16>, vector<8x128xf32> -> vector<8x128xf32>
    %50 = vector.extract_strided_slice %43 {offsets = [0, 256], sizes = [8, 128], strides = [1, 1]} : vector<8x384xf32> to vector<8x128xf32>
    %51 = arith.addf %49, %50 : vector<8x128xf32>
    %c0_28 = arith.constant 0 : index
    %c0_29 = arith.constant 0 : index
    %52 = vector.load %arg9[%c0_28, %c0_29] : memref<8x128xf32, #tpu.memory_space<vmem>>, vector<8x128xf32>
    tpu.vector_store %arg9[%c0_28, %c0_29], %51 {strides = array<i32>} : memref<8x128xf32, #tpu.memory_space<vmem>>, vector<8x128xf32>,
    return
  }
  func.func @transform_0(%arg0: i32) -> (i32, i32) {
    %c0_i32 = arith.constant 0 : i32
    %c0_i32_0 = arith.constant 0 : i32
    return %arg0, %c0_i32 : i32, i32
  }
  func.func @transform_1(%arg0: i32) -> (i32, i32) {
    %c0_i32 = arith.constant 0 : i32
    %c0_i32_0 = arith.constant 0 : i32
    %c0_i32_1 = arith.constant 0 : i32
    return %c0_i32, %c0_i32_0 : i32, i32
  }
  func.func @transform_2(%arg0: i32) -> (i32, i32) {
    %c0_i32 = arith.constant 0 : i32
    %c0_i32_0 = arith.constant 0 : i32
    %c0_i32_1 = arith.constant 0 : i32
    return %c0_i32, %c0_i32_0 : i32, i32
  }
  func.func @transform_3(%arg0: i32) -> (i32, i32) {
    %c0_i32 = arith.constant 0 : i32
    %c0_i32_0 = arith.constant 0 : i32
    %c0_i32_1 = arith.constant 0 : i32
    return %c0_i32, %c0_i32_0 : i32, i32
  }
  func.func @transform_4(%arg0: i32) -> (i32, i32) {
    %c0_i32 = arith.constant 0 : i32
    %c0_i32_0 = arith.constant 0 : i32
    %c0_i32_1 = arith.constant 0 : i32
    return %c0_i32, %c0_i32_0 : i32, i32
  }
  func.func @transform_5(%arg0: i32) -> (i32, i32) {
    %c0_i32 = arith.constant 0 : i32
    %c0_i32_0 = arith.constant 0 : i32
    %c0_i32_1 = arith.constant 0 : i32
    return %c0_i32, %c0_i32_0 : i32, i32
  }
  func.func @transform_6(%arg0: i32) -> (i32, i32) {
    %c0_i32 = arith.constant 0 : i32
    %c0_i32_0 = arith.constant 0 : i32
    %c0_i32_1 = arith.constant 0 : i32
    return %c0_i32, %c0_i32_0 : i32, i32
  }
  func.func @transform_7(%arg0: i32) -> (i32, i32) {
    %c0_i32 = arith.constant 0 : i32
    %c0_i32_0 = arith.constant 0 : i32
    %c0_i32_1 = arith.constant 0 : i32
    return %c0_i32, %c0_i32_0 : i32, i32
  }
  func.func @transform_8(%arg0: i32) -> (i32, i32) {
    %c0_i32 = arith.constant 0 : i32
    %c0_i32_0 = arith.constant 0 : i32
    return %arg0, %c0_i32 : i32, i32
  }
}

</mosaic_0001>

<bundles_post_ra>
// kernel: tpu_custom_call.1
= control target key start
LH: loop header
LB: loop body
LE: loop exit
PB: predicated region body
PF: predicated region fallthrough
CT: control target
= control target key end

     0   :  { %13 = vsyncpa [#allocation3], 0  ;;  %s2513_s0 = inlined_call_operand.vmem [shape: f32[8,256], index: 0, kind: input, shape index: {}]   ;;  %s2514_s1 = inlined_call_operand.hbm [shape: bf16[256,512], index: 1, kind: input, shape index: {}]   ;;  %s2515_s2 = inlined_call_operand.hbm [shape: bf16[512,256], index: 2, kind: input, shape index: {}]   ;;  %s2516_s3 = inlined_call_operand.hbm [shape: bf16[256,128], index: 3, kind: input, shape index: {}]   ;;  %s2517_s4 = inlined_call_operand.vmem [shape: bf16[128,8], index: 4, kind: input, shape index: {}]   ;;  %s2518_s5 = inlined_call_operand.vmem [shape: f32[1,1024], index: 5, kind: input, shape index: {}]   ;;  %s2519_s6 = inlined_call_operand.hbm [shape: bf16[256,128], index: 6, kind: input, shape index: {}]   ;;  %s2520_s7 = inlined_call_operand.vmem [shape: bf16[8,384], index: 7, kind: input, shape index: {}]   ;;  %s2521_s8 = inlined_call_operand.hbm [shape: f32[8,128], index: 8, kind: output, shape index: {}]  }
   0x1   :  { %14 = vsyncpa [#allocation6], 0 }
   0x2   :  { %15 = vsyncpa [#allocation9], 0 }
   0x3   :  { %16 = vsyncpa [#allocation4], 0  ;;  %s2299_s27 = smov [#allocation5]   ;;  %s2181_s9 = scalar_lea.hbm %s2515_s2, 8192 }
   0x4   :  { %s36_s28 = sshll.u32 %s2299_s27, 4  ;;  %p2182_p0 = scmp.ne.s32.totalorder %s2515_s2, %s2181_s9  ;;  %s37_s28 = int_to_ptr.vmem [resolvable:$true] %s36_s28 }
   0x5   :  { %p2185_p1 = scmp.lt.u32.totalorder %s2181_s9, %s2515_s2 }
   0x7   :  { %p2187_p2 = pnand %p2185_p1, %p2182_p0 }
   0x9   :  { %2190 = shalt.err (!%p2187_p2)
}
   0xa   :  { %s2191_s14 = scalar_lea.vmem %s37_s28, 8192  ;;  %p2196_p4 = scmp.lt.s32.totalorder %s37_s28, %s37_s28 }
   0xb   :  { %p2192_p3 = scmp.ne.s32.totalorder %s37_s28, %s2191_s14  ;;  %p2197_p5 = scmp.lt.s32.totalorder %s2191_s14, %s2191_s14 }
   0xd   :  { %p2198_p6 = por %p2197_p5, %p2196_p4 }
   0xf   :  { %p2199_p7 = pnand %p2198_p6, %p2192_p3 }
  0x11   :  { %2202 = shalt.err (!%p2199_p7)
}
  0x12   :  { %s2300_s15 = smov 128   ;;  %s2301_s16 = smov 8  }
  0x13   :  { %42 = dma.hbm_to_vmem [thread:$0]  %s2515_s2, 8192, %s37_s28, [#allocation6], %s2300_s15, %s2300_s15, %s2301_s16  }
  0x14   :  { %s2302_s19 = smov [#allocation2]   ;;  %s2203_s23 = scalar_lea.hbm %s2514_s1, 8192 }
  0x15   :  { %s24_s20 = sshll.u32 %s2302_s19, 4  ;;  %p2204_p8 = scmp.ne.s32.totalorder %s2514_s1, %s2203_s23  ;;  %s25_s20 = int_to_ptr.vmem [resolvable:$true] %s24_s20 }
  0x16   :  { %p2207_p9 = scmp.lt.u32.totalorder %s2203_s23, %s2514_s1 }
  0x18   :  { %p2209_p10 = pnand %p2207_p9, %p2204_p8 }
  0x1a   :  { %2212 = shalt.err (!%p2209_p10)
}
  0x1b   :  { %s2213_s29 = scalar_lea.vmem %s25_s20, 8192  ;;  %p2218_p12 = scmp.lt.s32.totalorder %s25_s20, %s25_s20 }
  0x1c   :  { %p2214_p11 = scmp.ne.s32.totalorder %s25_s20, %s2213_s29  ;;  %p2219_p13 = scmp.lt.s32.totalorder %s2213_s29, %s2213_s29 }
  0x1e   :  { %p2220_p0 = por %p2219_p13, %p2218_p12 }
  0x20   :  { %p2221_p1 = pnand %p2220_p0, %p2214_p11 }
  0x22   :  { %2224 = shalt.err (!%p2221_p1)
}
  0x23   :  { %s2303_s2 = smov 256   ;;  %s2304_s28 = smov 16  }
  0x24   :  { %30 = dma.hbm_to_vmem [thread:$0]  %s2514_s1, 8192, %s25_s20, [#allocation3], %s2303_s2, %s2303_s2, %s2304_s28  }
  0x25   :  { %s2305_s10 = smov [#allocation7]   ;;  %s2225_s14 = scalar_lea.hbm %s2516_s3, 2048 }
  0x26   :  { %s48_s11 = sshll.u32 %s2305_s10, 4  ;;  %p2226_p2 = scmp.ne.s32.totalorder %s2516_s3, %s2225_s14  ;;  %s49_s11 = int_to_ptr.vmem [resolvable:$true] %s48_s11 }
  0x27   :  { %p2229_p3 = scmp.lt.u32.totalorder %s2225_s14, %s2516_s3 }
  0x29   :  { %p2231_p4 = pnand %p2229_p3, %p2226_p2 }
  0x2b   :  { %2234 = shalt.err (!%p2231_p4)
}
  0x2c   :  { %s2235_s19 = scalar_lea.vmem %s49_s11, 2048  ;;  %p2240_p6 = scmp.lt.s32.totalorder %s49_s11, %s49_s11 }
  0x2d   :  { %p2236_p5 = scmp.ne.s32.totalorder %s49_s11, %s2235_s19  ;;  %p2241_p7 = scmp.lt.s32.totalorder %s2235_s19, %s2235_s19 }
  0x2f   :  { %p2242_p8 = por %p2241_p7, %p2240_p6 }
  0x31   :  { %p2243_p9 = pnand %p2242_p8, %p2236_p5 }
  0x33   :  { %2246 = shalt.err (!%p2243_p9)
}
  0x34   :  { %s2306_s1 = smov 64   ;;  %s2307_s20 = smov 4  }
  0x35   :  { %54 = dma.hbm_to_vmem [thread:$0]  %s2516_s3, 2048, %s49_s11, [#allocation6], %s2306_s1, %s2306_s1, %s2307_s20  }
  0x36   :  { %s2308_s23 = smov [#allocation8]   ;;  %s2247_s27 = scalar_lea.hbm %s2519_s6, 2048 }
  0x37   :  { %s64_s24 = sshll.u32 %s2308_s23, 4  ;;  %p2248_p10 = scmp.ne.s32.totalorder %s2519_s6, %s2247_s27  ;;  %s65_s24 = int_to_ptr.vmem [resolvable:$true] %s64_s24 }
  0x38   :  { %p2251_p11 = scmp.lt.u32.totalorder %s2247_s27, %s2519_s6 }
  0x3a   :  { %p2253_p12 = pnand %p2251_p11, %p2248_p10 }
  0x3c   :  { %2256 = shalt.err (!%p2253_p12)
}
  0x3d   :  { %s2257_s9 = scalar_lea.vmem %s65_s24, 2048  ;;  %p2262_p0 = scmp.lt.s32.totalorder %s65_s24, %s65_s24 }
  0x3e   :  { %p2258_p13 = scmp.ne.s32.totalorder %s65_s24, %s2257_s9  ;;  %p2263_p1 = scmp.lt.s32.totalorder %s2257_s9, %s2257_s9 }
  0x40   :  { %p2264_p2 = por %p2263_p1, %p2262_p0 }
  0x42   :  { %p2265_p3 = pnand %p2264_p2, %p2258_p13 }
  0x44   :  { %2268 = shalt.err (!%p2265_p3)
}
  0x45   :  { %70 = dma.hbm_to_vmem [thread:$0]  %s2519_s6, 2048, %s65_s24, [#allocation9], %s2306_s1, %s2306_s1, %s2307_s20  }
  0x46   :  { %2291 = dma.done.wait [#allocation3], 8192  }
  0x47   :  { %2292 = vsyncadd [#allocation3], 4294959104 }
  0x48   :  { %2293 = dma.done.wait [#allocation6], 10240  }
  0x49   :  { %2294 = vsyncadd [#allocation6], 4294957056 }
  0x4a   :  { %2295 = dma.done.wait [#allocation9], 2048  }
  0x4b   :  { %2296 = vsyncadd [#allocation9], 4294965248  ;;  %v1942_v0 = vld [vmem:[#allocation2 + $0x4] ss:$16 sps:$4 sm:$0xff]   ;;  %v1944_v1 = vld [vmem:[#allocation2] ss:$16 sps:$4 sm:$0xff]  }
  0x4c   :  { %496 = vmatprep.subr.bf16.mxu0 %v1942_v0  ;;  %v1945_v2 = vld [vmem:[#allocation2 + $0x24] ss:$16 sps:$4 sm:$0xff]   ;;  %v1947_v3 = vld [vmem:[#allocation2 + $0x20] ss:$16 sps:$4 sm:$0xff]   ;;  %v1989_v13 = vld [vmem:[#allocation2 + $0xc] ss:$16 sps:$4 sm:$0xff]  }
  0x4d   :  { %497 = vmatpush1.bf16.msra.mxu0 %v1944_v1  ;;  %v1948_v4 = vld [vmem:[#allocation2 + $0x44] ss:$16 sps:$4 sm:$0xff]   ;;  %v1950_v5 = vld [vmem:[#allocation2 + $0x40] ss:$16 sps:$4 sm:$0xff]   ;;  %v1992_v15 = vld [vmem:[#allocation2 + $0x8] ss:$16 sps:$4 sm:$0xff]   ;;  %537 = vmatprep.subr.bf16.mxu1 %v1989_v13 }
  0x4e   :  { %498 = vmatprep.subr.bf16.mxu0 %v1945_v2  ;;  %v1951_v6 = vld [vmem:[#allocation2 + $0x64] ss:$16 sps:$4 sm:$0xff]   ;;  %v1953_v7 = vld [vmem:[#allocation2 + $0x60] ss:$16 sps:$4 sm:$0xff]   ;;  %v87_v16 = vld [vmem:[%s2513_s0 + $0x8] sm:$0xff]  ;;  %538 = vmatpush1.bf16.msra.mxu1 %v1992_v15  ;;  %vm2310_vm0 = vmmov 0  }
  0x4f   :  { %v1954_v8 = vld [vmem:[#allocation2 + $0x84] ss:$16 sps:$4 sm:$0xff]   ;;  %v1956_v9 = vld [vmem:[#allocation2 + $0x80] ss:$16 sps:$4 sm:$0xff]   ;;  %v2409_v18 = vpack.c.bf16 %v87_v16, %v87_v16  ;;  %v1993_v19 = vld [vmem:[#allocation2 + $0x2c] ss:$16 sps:$4 sm:$0xff]  }
  0x50   :  { %v1957_v10 = vld [vmem:[#allocation2 + $0xa4] ss:$16 sps:$4 sm:$0xff]   ;;  %v1959_v11 = vld [vmem:[#allocation2 + $0xa0] ss:$16 sps:$4 sm:$0xff]   ;;  %v1995_v20 = vld [vmem:[#allocation2 + $0x28] ss:$16 sps:$4 sm:$0xff]   ;;  %539 = vmatprep.subr.bf16.mxu1 %v1993_v19 }
  0x51   :  { %499 = vmatpush1.bf16.msra.mxu0 %v1947_v3  ;;  %v1960_v12 = vld [vmem:[#allocation2 + $0xc4] ss:$16 sps:$4 sm:$0xff]   ;;  %v1962_v14 = vld [vmem:[#allocation2 + $0xc0] ss:$16 sps:$4 sm:$0xff]   ;;  %528 = vmatprep.mubr.bf16.mxu0 %v2409_v18  ;;  %v1996_v21 = vld [vmem:[#allocation2 + $0x4c] ss:$16 sps:$4 sm:$0xff]  }
  0x52   :  { %500 = vmatprep.subr.bf16.mxu0 %v1948_v4  ;;  %v1963_v17 = vld [vmem:[#allocation2 + $0xe4] ss:$16 sps:$4 sm:$0xff]   ;;  %569 = vmatprep.mubr.bf16.mxu1 %v2409_v18  ;;  %v1965_v22 = vld [vmem:[#allocation2 + $0xe0] ss:$16 sps:$4 sm:$0xff]   ;;  %v1998_v24 = vld [vmem:[#allocation2 + $0x48] ss:$16 sps:$4 sm:$0xff]  }
  0x53   :  { %v1966_v23 = vld [vmem:[#allocation2 + $0x104] ss:$16 sps:$4 sm:$0xff]   ;;  %540 = vmatpush1.bf16.msra.mxu1 %v1995_v20  ;;  %v1999_v25 = vld [vmem:[#allocation2 + $0x6c] ss:$16 sps:$4 sm:$0xff]   ;;  %v1968_v26 = vld [vmem:[#allocation2 + $0x100] ss:$16 sps:$4 sm:$0xff]  }
  0x54   :  { %541 = vmatprep.subr.bf16.mxu1 %v1996_v21  ;;  %v1969_v27 = vld [vmem:[#allocation2 + $0x124] ss:$16 sps:$4 sm:$0xff]   ;;  %v2001_v28 = vld [vmem:[#allocation2 + $0x68] ss:$16 sps:$4 sm:$0xff]   ;;  %v2002_v29 = vld [vmem:[#allocation2 + $0x8c] ss:$16 sps:$4 sm:$0xff]  }
  0x55   :  { %501 = vmatpush1.bf16.msra.mxu0 %v1950_v5  ;;  %v1971_v30 = vld [vmem:[#allocation2 + $0x120] ss:$16 sps:$4 sm:$0xff]   ;;  %v1972_v31 = vld [vmem:[#allocation2 + $0x144] ss:$16 sps:$4 sm:$0xff]   ;;  %v2004_v32 = vld [vmem:[#allocation2 + $0x88] ss:$16 sps:$4 sm:$0xff]  }
  0x56   :  { %502 = vmatprep.subr.bf16.mxu0 %v1951_v6  ;;  %v2005_v33 = vld [vmem:[#allocation2 + $0xac] ss:$16 sps:$4 sm:$0xff]   ;;  %v1974_v34 = vld [vmem:[#allocation2 + $0x140] ss:$16 sps:$4 sm:$0xff]   ;;  %v1975_v35 = vld [vmem:[#allocation2 + $0x164] ss:$16 sps:$4 sm:$0xff]  }
  0x57   :  { %542 = vmatpush1.bf16.msra.mxu1 %v1998_v24  ;;  %v2007_v36 = vld [vmem:[#allocation2 + $0xa8] ss:$16 sps:$4 sm:$0xff]   ;;  %v2008_v37 = vld [vmem:[#allocation2 + $0xcc] ss:$16 sps:$4 sm:$0xff]   ;;  %v1977_v38 = vld [vmem:[#allocation2 + $0x160] ss:$16 sps:$4 sm:$0xff]  }
  0x58   :  { %543 = vmatprep.subr.bf16.mxu1 %v1999_v25  ;;  %v1978_v39 = vld [vmem:[#allocation2 + $0x184] ss:$16 sps:$4 sm:$0xff]   ;;  %v2010_v40 = vld [vmem:[#allocation2 + $0xc8] ss:$16 sps:$4 sm:$0xff]   ;;  %v2011_v41 = vld [vmem:[#allocation2 + $0xec] ss:$16 sps:$4 sm:$0xff]  }
  0x59   :  { %503 = vmatpush1.bf16.msra.mxu0 %v1953_v7  ;;  %v1980_v42 = vld [vmem:[#allocation2 + $0x180] ss:$16 sps:$4 sm:$0xff]   ;;  %v1981_v43 = vld [vmem:[#allocation2 + $0x1a4] ss:$16 sps:$4 sm:$0xff]   ;;  %v2013_v44 = vld [vmem:[#allocation2 + $0xe8] ss:$16 sps:$4 sm:$0xff]  }
  0x5a   :  { %504 = vmatprep.subr.bf16.mxu0 %v1954_v8  ;;  %v2014_v45 = vld [vmem:[#allocation2 + $0x10c] ss:$16 sps:$4 sm:$0xff]   ;;  %v1983_v46 = vld [vmem:[#allocation2 + $0x1a0] ss:$16 sps:$4 sm:$0xff]   ;;  %v1984_v47 = vld [vmem:[#allocation2 + $0x1c4] ss:$16 sps:$4 sm:$0xff]  }
  0x5b   :  { %544 = vmatpush1.bf16.msra.mxu1 %v2001_v28  ;;  %v2016_v48 = vld [vmem:[#allocation2 + $0x108] ss:$16 sps:$4 sm:$0xff]   ;;  %v2017_v49 = vld [vmem:[#allocation2 + $0x12c] ss:$16 sps:$4 sm:$0xff]   ;;  %v1986_v50 = vld [vmem:[#allocation2 + $0x1c0] ss:$16 sps:$4 sm:$0xff]  }
  0x5c   :  { %545 = vmatprep.subr.bf16.mxu1 %v2002_v29  ;;  %v1987_v51 = vld [vmem:[#allocation2 + $0x1e4] ss:$16 sps:$4 sm:$0xff]   ;;  %v2019_v52 = vld [vmem:[#allocation2 + $0x128] ss:$16 sps:$4 sm:$0xff]   ;;  %v2020_v53 = vld [vmem:[#allocation2 + $0x14c] ss:$16 sps:$4 sm:$0xff]  }
  0x5d   :  { %505 = vmatpush1.bf16.msra.mxu0 %v1956_v9  ;;  %v1991_v54 = vld [vmem:[#allocation2 + $0x1e0] ss:$16 sps:$4 sm:$0xff]   ;;  %v2022_v56 = vld [vmem:[#allocation2 + $0x148] ss:$16 sps:$4 sm:$0xff]   ;;  %v2040_v57 = vld [vmem:[#allocation5 + $0x4] ss:$8 sps:$4 sm:$0xff]  }
  0x5e   :  { %506 = vmatprep.subr.bf16.mxu0 %v1957_v10  ;;  %v86_v55 = vld [vmem:[%s2513_s0] sm:$0xff]  ;;  %v2023_v58 = vld [vmem:[#allocation2 + $0x16c] ss:$16 sps:$4 sm:$0xff]   ;;  %v2025_v61 = vld [vmem:[#allocation2 + $0x168] ss:$16 sps:$4 sm:$0xff]   ;;  %vm1356_vm1 = vcmask 64512  }
  0x5f   :  { %546 = vmatpush1.bf16.msra.mxu1 %v2004_v32  ;;  %v2038_v59 = vld [vmem:[#allocation5] ss:$8 sps:$4 sm:$0xff]   ;;  %v2416_v60 = vpack.c.bf16 %v86_v55, %v86_v55  ;;  %v2043_v62 = vld [vmem:[#allocation5 + $0x14] ss:$8 sps:$4 sm:$0xff]   ;;  %v2041_v0 = vld [vmem:[#allocation5 + $0x10] ss:$8 sps:$4 sm:$0xff]  }
  0x60   :  { %547 = vmatprep.subr.bf16.mxu1 %v2005_v33  ;;  %v2026_v63 = vld [vmem:[#allocation2 + $0x18c] ss:$16 sps:$4 sm:$0xff]   ;;  %v2028_v1 = vld [vmem:[#allocation2 + $0x188] ss:$16 sps:$4 sm:$0xff]   ;;  %vm1382_vm2 = vcmask 1043456  }
  0x61   :  { %507 = vmatpush1.bf16.msra.mxu0 %v1959_v11  ;;  %v2046_v2 = vld [vmem:[#allocation5 + $0x24] ss:$8 sps:$4 sm:$0xff]   ;;  %v2044_v4 = vld [vmem:[#allocation5 + $0x20] ss:$8 sps:$4 sm:$0xff]   ;;  %v2049_v6 = vld [vmem:[#allocation5 + $0x34] ss:$8 sps:$4 sm:$0xff]  }
  0x62   :  { %508 = vmatprep.subr.bf16.mxu0 %v1960_v12  ;;  %v2029_v3 = vld [vmem:[#allocation2 + $0x1ac] ss:$16 sps:$4 sm:$0xff]   ;;  %v2031_v5 = vld [vmem:[#allocation2 + $0x1a8] ss:$16 sps:$4 sm:$0xff]  }
  0x63   :  { %548 = vmatpush1.bf16.msra.mxu1 %v2007_v36  ;;  %v2032_v7 = vld [vmem:[#allocation2 + $0x1cc] ss:$16 sps:$4 sm:$0xff]   ;;  %v2047_v8 = vld [vmem:[#allocation5 + $0x30] ss:$8 sps:$4 sm:$0xff]   ;;  %v2050_v12 = vld [vmem:[#allocation5 + $0x40] ss:$8 sps:$4 sm:$0xff]  }
  0x64   :  { %549 = vmatprep.subr.bf16.mxu1 %v2008_v37  ;;  %v2034_v9 = vld [vmem:[#allocation2 + $0x1c8] ss:$16 sps:$4 sm:$0xff]   ;;  %v2052_v10 = vld [vmem:[#allocation5 + $0x44] ss:$8 sps:$4 sm:$0xff]   ;;  %v2061_v19 = vld [vmem:[#allocation5 + $0x74] ss:$8 sps:$4 sm:$0xff]  }
  0x65   :  { %509 = vmatpush1.bf16.msra.mxu0 %v1962_v14  ;;  %v2035_v11 = vld [vmem:[#allocation2 + $0x1ec] ss:$16 sps:$4 sm:$0xff]   ;;  %v2037_v13 = vld [vmem:[#allocation2 + $0x1e8] ss:$16 sps:$4 sm:$0xff]  }
  0x66   :  { %510 = vmatprep.subr.bf16.mxu0 %v1963_v17  ;;  %v2055_v14 = vld [vmem:[#allocation5 + $0x54] ss:$8 sps:$4 sm:$0xff]   ;;  %v2053_v15 = vld [vmem:[#allocation5 + $0x50] ss:$8 sps:$4 sm:$0xff]   ;;  %v2058_v16 = vld [vmem:[#allocation5 + $0x64] ss:$8 sps:$4 sm:$0xff]  }
  0x67   :  { %550 = vmatpush1.bf16.msra.mxu1 %v2010_v40  ;;  %v2056_v17 = vld [vmem:[#allocation5 + $0x60] ss:$8 sps:$4 sm:$0xff]   ;;  %v2059_v20 = vld [vmem:[#allocation5 + $0x70] ss:$8 sps:$4 sm:$0xff]   ;;  %v2064_v21 = vld [vmem:[#allocation5 + $0x84] ss:$8 sps:$4 sm:$0xff]  }
  0x68   :  { %551 = vmatprep.subr.bf16.mxu1 %v2011_v41  ;;  %v2065_v24 = vld [vmem:[#allocation5 + $0x90] ss:$8 sps:$4 sm:$0xff]   ;;  %v2070_v25 = vld [vmem:[#allocation5 + $0xa4] ss:$8 sps:$4 sm:$0xff]  }
  0x69   :  { %511 = vmatpush1.bf16.msra.mxu0 %v1965_v22  ;;  %v2062_v22 = vld [vmem:[#allocation5 + $0x80] ss:$8 sps:$4 sm:$0xff]   ;;  %v2071_v28 = vld [vmem:[#allocation5 + $0xb0] ss:$8 sps:$4 sm:$0xff]   ;;  %v2076_v29 = vld [vmem:[#allocation5 + $0xc4] ss:$8 sps:$4 sm:$0xff]  }
  0x6a   :  { %512 = vmatprep.subr.bf16.mxu0 %v1966_v23  ;;  %v2067_v23 = vld [vmem:[#allocation5 + $0x94] ss:$8 sps:$4 sm:$0xff]   ;;  %v2077_v32 = vld [vmem:[#allocation5 + $0xd0] ss:$8 sps:$4 sm:$0xff]   ;;  %v2082_v33 = vld [vmem:[#allocation5 + $0xe4] ss:$8 sps:$4 sm:$0xff]  }
  0x6b   :  { %552 = vmatpush1.bf16.msra.mxu1 %v2013_v44  ;;  %v2083_v36 = vld [vmem:[#allocation5 + $0xf0] ss:$8 sps:$4 sm:$0xff]   ;;  %v2088_v37 = vld [vmem:[#allocation5 + $0x104] ss:$8 sps:$4 sm:$0xff]  }
  0x6c   :  { %553 = vmatprep.subr.bf16.mxu1 %v2014_v45  ;;  %v2136_v40 = vld [vmem:[#allocation7 + $0x48] sm:$0xff]   ;;  %v2140_v44 = vld [vmem:[#allocation7 + $0x58] sm:$0xff]  }
  0x6d   :  { %513 = vmatpush1.bf16.msra.mxu0 %v1968_v26  ;;  %v2068_v26 = vld [vmem:[#allocation5 + $0xa0] ss:$8 sps:$4 sm:$0xff]   ;;  %v2141_v45 = vld [vmem:[#allocation7 + $0x18] sm:$0xff]  }
  0x6e   :  { %514 = vmatprep.subr.bf16.mxu0 %v1969_v27  ;;  %v2073_v27 = vld [vmem:[#allocation5 + $0xb4] ss:$8 sps:$4 sm:$0xff]   ;;  %v2137_v41 = vld [vmem:[#allocation7 + $0x8] sm:$0xff]  }
  0x6f   :  { %554 = vmatpush1.bf16.msra.mxu1 %v2016_v48  ;;  %v2144_v48 = vld [vmem:[#allocation7 + $0x68] sm:$0xff]  }
  0x70   :  { %555 = vmatprep.subr.bf16.mxu1 %v2017_v49  ;;  %v2145_v49 = vld [vmem:[#allocation7 + $0x28] sm:$0xff]  }
  0x71   :  { %515 = vmatpush1.bf16.msra.mxu0 %v1971_v30  ;;  %v2074_v30 = vld [vmem:[#allocation5 + $0xc0] ss:$8 sps:$4 sm:$0xff]  }
  0x72   :  { %516 = vmatprep.subr.bf16.mxu0 %v1972_v31  ;;  %v2079_v31 = vld [vmem:[#allocation5 + $0xd4] ss:$8 sps:$4 sm:$0xff]  }
  0x73   :  { %556 = vmatpush1.bf16.msra.mxu1 %v2019_v52 }
  0x74   :  { %557 = vmatprep.subr.bf16.mxu1 %v2020_v53  ;;  %v2426_v53 = vld [vmem:[%s2518_s5] sm:$0xf] }
  0x75   :  { %517 = vmatpush1.bf16.msra.mxu0 %v1974_v34  ;;  %v2080_v34 = vld [vmem:[#allocation5 + $0xe0] ss:$8 sps:$4 sm:$0xff]  }
  0x76   :  { %518 = vmatprep.subr.bf16.mxu0 %v1975_v35  ;;  %v2085_v35 = vld [vmem:[#allocation5 + $0xf4] ss:$8 sps:$4 sm:$0xff]  }
  0x77   :  { %558 = vmatpush1.bf16.msra.mxu1 %v2022_v56 }
  0x78   :  { %559 = vmatprep.subr.bf16.mxu1 %v2023_v58 }
  0x79   :  { %519 = vmatpush1.bf16.msra.mxu0 %v1977_v38  ;;  %v2134_v38 = vld [vmem:[#allocation7 + $0x40] sm:$0xff]  }
  0x7a   :  { %520 = vmatprep.subr.bf16.mxu0 %v1978_v39  ;;  %v2135_v39 = vld [vmem:[#allocation7] sm:$0xff]  }
  0x7b   :  { %560 = vmatpush1.bf16.msra.mxu1 %v2025_v61 }
  0x7c   :  { %561 = vmatprep.subr.bf16.mxu1 %v2026_v63 }
  0x7d   :  { %521 = vmatpush1.bf16.msra.mxu0 %v1980_v42  ;;  %v2138_v42 = vld [vmem:[#allocation7 + $0x50] sm:$0xff]  }
  0x7e   :  { %522 = vmatprep.subr.bf16.mxu0 %v1981_v43  ;;  %v2139_v43 = vld [vmem:[#allocation7 + $0x10] sm:$0xff]  }
  0x7f   :  { %562 = vmatpush1.bf16.msra.mxu1 %v2028_v1 }
  0x80   :  { %563 = vmatprep.subr.bf16.mxu1 %v2029_v3  ;;  %v2086_v3 = vld [vmem:[#allocation5 + $0x100] ss:$8 sps:$4 sm:$0xff]  }
  0x81   :  { %523 = vmatpush1.bf16.msra.mxu0 %v1983_v46  ;;  %v2142_v46 = vld [vmem:[#allocation7 + $0x60] sm:$0xff]  }
  0x82   :  { %524 = vmatprep.subr.bf16.mxu0 %v1984_v47  ;;  %v2143_v47 = vld [vmem:[#allocation7 + $0x20] sm:$0xff]  }
  0x83   :  { %564 = vmatpush1.bf16.msra.mxu1 %v2031_v5  ;;  %v2091_v5 = vld [vmem:[#allocation5 + $0x114] ss:$8 sps:$4 sm:$0xff]  }
  0x84   :  { %565 = vmatprep.subr.bf16.mxu1 %v2032_v7  ;;  %v2094_v7 = vld [vmem:[#allocation5 + $0x124] ss:$8 sps:$4 sm:$0xff]  }
  0x85   :  { %525 = vmatpush1.bf16.msra.mxu0 %v1986_v50  ;;  %v156_v50 = vlaneseq }
  0x86   :  { %526 = vmatprep.subr.bf16.mxu0 %v1987_v51 }
  0x87   :  { %566 = vmatpush1.bf16.msra.mxu1 %v2034_v9  ;;  %v2420_v51 = vshrl.u32 %v156_v50, 7  ;;  %v2097_v9 = vld [vmem:[#allocation5 + $0x134] ss:$8 sps:$4 sm:$0xff]  }
  0x88   :  { %567 = vmatprep.subr.bf16.mxu1 %v2035_v11  ;;  %v2095_v11 = vld [vmem:[#allocation5 + $0x130] ss:$8 sps:$4 sm:$0xff]  }
  0x89   :  { %527 = vmatpush1.bf16.msra.mxu0 %v1991_v54  ;;  %v158_v52 = vsub.s32 0, %v2420_v51  ;;  %v162_v54 = vsub.s32 1, %v2420_v51  ;;  %v2146_v50 = vld [vmem:[#allocation7 + $0x70] sm:$0xff]  }
  0x8a   :  { %982 = vmatprep.subr.bf16.mxu0 %v2040_v57 }
  0x8b   :  { %568 = vmatpush1.bf16.msra.mxu1 %v2037_v13  ;;  %v159_v55 = vrot.slane %v2426_v53, %v158_v52  ;;  %v163_v56 = vrot.slane %v2426_v53, %v162_v54 }
  0x8c   :  { %529 = vmatmul.mubr.bf16.vlgmr.msra.gmra.mrb[0].mxu0 %v2416_v60  ;;  %1841 = vmatprep.subr.bf16.mxu1 %v2134_v38  ;;  %v2122_v38 = vld [vmem:[#allocation5 + $0x1c0] ss:$8 sps:$4 sm:$0xff]  }
  0x8d   :  { %983 = vmatpush1.bf16.msra.mxu0 %v2038_v59 }
  0x8e   :  { %984 = vmatprep.subr.bf16.mxu0 %v2043_v62  ;;  %570 = vmatmul.mubr.bf16.vlgmr.msra.gmra.mrb[0].mxu1 %v2416_v60 }
  0x8f   :  { %1842 = vmatpush3.bf16.msra.mxu1 %v2135_v39  ;;  %v166_v39 = vsub.s32 2, %v2420_v51 }
  0x90   :  { %1843 = vmatprep.subr.bf16.mxu1 %v2136_v40  ;;  %v2127_v40 = vld [vmem:[#allocation5 + $0x1d4] ss:$8 sps:$4 sm:$0xff]  }
  0x91   :  { %985 = vmatpush1.bf16.msra.mxu0 %v2041_v0 }
  0x92   :  { %986 = vmatprep.subr.bf16.mxu0 %v2046_v2 }
  0x93   :  { %1844 = vmatpush3.bf16.msra.mxu1 %v2137_v41  ;;  %v2125_v41 = vld [vmem:[#allocation5 + $0x1d0] ss:$8 sps:$4 sm:$0xff]  }
  0x94   :  { %1845 = vmatprep.subr.bf16.mxu1 %v2138_v42  ;;  %v167_v42 = vrot.slane %v2426_v53, %v166_v39  ;;  %v2311_v39 = vmov 0  }
  0x95   :  { %987 = vmatpush1.bf16.msra.mxu0 %v2044_v4 }
  0x96   :  { %988 = vmatprep.subr.bf16.mxu0 %v2049_v6  ;;  %v2089_v6 = vld [vmem:[#allocation5 + $0x110] ss:$8 sps:$4 sm:$0xff]  }
  0x97   :  { %1846 = vmatpush3.bf16.msra.mxu1 %v2139_v43  ;;  %v2130_v43 = vld [vmem:[#allocation5 + $0x1e4] ss:$8 sps:$4 sm:$0xff]  }
  0x98   :  { %1847 = vmatprep.subr.bf16.mxu1 %v2140_v44  ;;  %v2128_v44 = vld [vmem:[#allocation5 + $0x1e0] ss:$8 sps:$4 sm:$0xff]  }
  0x99   :  { %989 = vmatpush1.bf16.msra.mxu0 %v2047_v8  ;;  %v2092_v8 = vld [vmem:[#allocation5 + $0x120] ss:$8 sps:$4 sm:$0xff]  }
  0x9a   :  { %990 = vmatprep.subr.bf16.mxu0 %v2052_v10  ;;  %v170_v10 = vsub.s32 3, %v2420_v51  ;;  %v2151_v51 = vld [vmem:[%s2517_s4 + $0x8] sm:$0xff]  }
  0x9b   :  { %1848 = vmatpush3.bf16.msra.mxu1 %v2141_v45 }
  0x9c   :  { %1849 = vmatprep.subr.bf16.mxu1 %v2142_v46  ;;  %v171_v13 = vrot.slane %v2426_v53, %v170_v10  ;;  %v2133_v46 = vld [vmem:[#allocation5 + $0x1f4] ss:$8 sps:$4 sm:$0xff]   ;;  %v2155_v10 = vld [vmem:[%s2517_s4 + $0x28] sm:$0xff]  }
  0x9d   :  { %991 = vmatpush1.bf16.msra.mxu0 %v2050_v12  ;;  %v2100_v12 = vld [vmem:[#allocation5 + $0x144] ss:$8 sps:$4 sm:$0xff]   ;;  %v2149_v53 = vld [vmem:[#allocation7 + $0x38] sm:$0xff]  }
  0x9e   :  { %992 = vmatprep.subr.bf16.mxu0 %v2055_v14 }
  0x9f   :  { %1850 = vmatpush3.bf16.msra.mxu1 %v2143_v47  ;;  %v2131_v47 = vld [vmem:[#allocation5 + $0x1f0] ss:$8 sps:$4 sm:$0xff]  }
  0xa0   :  { %1851 = vmatprep.subr.bf16.mxu1 %v2144_v48 }
  0xa1   :  { %993 = vmatpush1.bf16.msra.mxu0 %v2053_v15  ;;  %v2098_v15 = vld [vmem:[#allocation5 + $0x140] ss:$8 sps:$4 sm:$0xff]  }
  0xa2   :  { %994 = vmatprep.subr.bf16.mxu0 %v2058_v16 }
  0xa3   :  { %1852 = vmatpush3.bf16.msra.mxu1 %v2145_v49 }
  0xa4   :  { %1853 = vmatprep.subr.bf16.mxu1 %v2146_v50  ;;  %v2165_v50 = vld [vmem:[#allocation8 + $0x50] sm:$0xff]  }
  0xa5   :  { %995 = vmatpush1.bf16.msra.mxu0 %v2056_v17  ;;  %v2103_v17 = vld [vmem:[#allocation5 + $0x154] ss:$8 sps:$4 sm:$0xff]  }
  0xa6   :  { %996 = vmatprep.subr.bf16.mxu0 %v2061_v19 }
  0xa9   :  { %997 = vmatpush1.bf16.msra.mxu0 %v2059_v20 }
  0xaa   :  { %998 = vmatprep.subr.bf16.mxu0 %v2064_v21 }
  0xad   :  { %999 = vmatpush1.bf16.msra.mxu0 %v2062_v22 }
  0xae   :  { %1000 = vmatprep.subr.bf16.mxu0 %v2067_v23  ;;  %v2101_v23 = vld [vmem:[#allocation5 + $0x150] ss:$8 sps:$4 sm:$0xff]  }
  0xb1   :  { %1001 = vmatpush1.bf16.msra.mxu0 %v2065_v24  ;;  %v2106_v24 = vld [vmem:[#allocation5 + $0x164] ss:$8 sps:$4 sm:$0xff]  }
  0xb2   :  { %1002 = vmatprep.subr.bf16.mxu0 %v2070_v25 }
  0xb5   :  { %1003 = vmatpush1.bf16.msra.mxu0 %v2068_v26  ;;  %v2104_v26 = vld [vmem:[#allocation5 + $0x160] ss:$8 sps:$4 sm:$0xff]  }
  0xb6   :  { %1004 = vmatprep.subr.bf16.mxu0 %v2073_v27  ;;  %v2109_v27 = vld [vmem:[#allocation5 + $0x174] ss:$8 sps:$4 sm:$0xff]  }
  0xb9   :  { %1005 = vmatpush1.bf16.msra.mxu0 %v2071_v28  ;;  %v2107_v28 = vld [vmem:[#allocation5 + $0x170] ss:$8 sps:$4 sm:$0xff]  }
  0xba   :  { %1006 = vmatprep.subr.bf16.mxu0 %v2076_v29  ;;  %v2112_v29 = vld [vmem:[#allocation5 + $0x184] ss:$8 sps:$4 sm:$0xff]  }
  0xbd   :  { %1007 = vmatpush1.bf16.msra.mxu0 %v2074_v30  ;;  %v2110_v30 = vld [vmem:[#allocation5 + $0x180] ss:$8 sps:$4 sm:$0xff]  }
  0xbe   :  { %1008 = vmatprep.subr.bf16.mxu0 %v2079_v31  ;;  %v2115_v31 = vld [vmem:[#allocation5 + $0x194] ss:$8 sps:$4 sm:$0xff]  }
  0xc1   :  { %1009 = vmatpush1.bf16.msra.mxu0 %v2077_v32  ;;  %v2113_v32 = vld [vmem:[#allocation5 + $0x190] ss:$8 sps:$4 sm:$0xff]  }
  0xc2   :  { %1010 = vmatprep.subr.bf16.mxu0 %v2082_v33  ;;  %v2118_v33 = vld [vmem:[#allocation5 + $0x1a4] ss:$8 sps:$4 sm:$0xff]  }
  0xc5   :  { %1011 = vmatpush1.bf16.msra.mxu0 %v2080_v34  ;;  %v2116_v34 = vld [vmem:[#allocation5 + $0x1a0] ss:$8 sps:$4 sm:$0xff]  }
  0xc6   :  { %1012 = vmatprep.subr.bf16.mxu0 %v2085_v35  ;;  %v2121_v35 = vld [vmem:[#allocation5 + $0x1b4] ss:$8 sps:$4 sm:$0xff]  }
  0xc9   :  { %1013 = vmatpush1.bf16.msra.mxu0 %v2083_v36  ;;  %v2119_v36 = vld [vmem:[#allocation5 + $0x1b0] ss:$8 sps:$4 sm:$0xff]  }
  0xca   :  { %1023 = vmatprep.subr.bf16.mxu0 %v2088_v37  ;;  %v2124_v37 = vld [vmem:[#allocation5 + $0x1c4] ss:$8 sps:$4 sm:$0xff]  }
 0x15f   :  { %v530_v57 = vpop.f32.mrb[0].mxu0 }
 0x160   :  { %v531_v58 = vadd.f32 %v530_v57, %v159_v55  ;;  %v532_v59 = vpop.f32.mrb[1].mxu0  ;;  %v2147_v55 = vld [vmem:[#allocation7 + $0x30] sm:$0xff]   ;;  %v2309_v57 = vmov 0.0  }
 0x161   :  { %v533_v61 = vadd.f32 %v532_v59, %v163_v56  ;;  %v534_v62 = vpop.f32.mrb[2].mxu0  ;;  %v571_v14 = vpop.f32.mrb[0].mxu1  ;;  %1854 = vmatpush3.bf16.msra.mxu1 %v2147_v55  ;;  %v2148_v56 = vld [vmem:[#allocation7 + $0x78] sm:$0xff]   ;;  %v2166_v55 = vld [vmem:[#allocation8 + $0x10] sm:$0xff]  }
 0x162   :  { %v578_v63 = vmax.f32 %v531_v58, 0.0  ;;  %v535_v0 = vpop.f32.mrb[3].mxu0  ;;  %v573_v16 = vpop.f32.mrb[1].mxu1  ;;  %v572_v45 = vadd.f32 %v571_v14, %v167_v42  ;;  %1855 = vmatprep.subr.bf16.mxu1 %v2148_v56  ;;  %v650_v58 = vld [vmem:[%s2518_s5 + $0x4] sm:$0x3]  ;;  %v2167_v56 = vld [vmem:[#allocation8 + $0x58] sm:$0xff]  }
 0x163   :  { %v579_v1 = vmax.f32 %v533_v61, 0.0  ;;  %v574_v19 = vadd.f32 %v573_v16, %v171_v13  ;;  %v575_v20 = vpop.f32.mrb[2].mxu1  ;;  %v655_v59 = vrot.slane %v650_v58, %v158_v52  ;;  %v659_v61 = vrot.slane %v650_v58, %v162_v54  ;;  %v2152_v52 = vld [vmem:[%s2517_s4 + $0x10] sm:$0xff]   ;;  %v2153_v54 = vld [vmem:[%s2517_s4 + $0x18] sm:$0xff]   ;;  %v1793_v14 = vld [vmem:[%s2518_s5 + $0x6] ss:$0 sm:$0xff] }
 0x164   :  { %v582_v4 = vpack.c.bf16 %v578_v63, %v578_v63  ;;  %v576_v21 = vpop.f32.mrb[3].mxu1  ;;  %v580_v48 = vmax.f32 %v572_v45, 0.0  ;;  %v2169_v58 = vld [vmem:[#allocation8 + $0x60] sm:$0xff]  }
 0x165   :  { %v583_v2 = vpack.c.bf16 %v579_v1, %v579_v1  ;;  %v581_v22 = vmax.f32 %v574_v19, 0.0  ;;  %1856 = vmatpush3.bf16.msra.mxu1 %v2149_v53  ;;  %v2168_v53 = vld [vmem:[#allocation8 + $0x18] sm:$0xff]  }
 0x166   :  { %v584_v49 = vpack.c.bf16 %v580_v48, %v580_v48  ;;  %1896 = vmatprep.subr.bf16.mxu1 %v2309_v57  ;;  %v2163_v48 = vld [vmem:[#allocation8 + $0x48] sm:$0xff]  }
 0x167   :  { %1014 = vmatprep.mubr.bf16.mxu0 %v583_v2  ;;  %v585_v25 = vpack.c.bf16 %v581_v22, %v581_v22 }
 0x168   :  { %1015 = vmatmul.mubr.bf16.vlgmr.msra.gmra.mrb[4].mxu0 %v582_v4 }
 0x169   :  { %1024 = vmatpush1.bf16.msra.mxu0 %v2086_v3  ;;  %1055 = vmatprep.mubr.bf16.mxu0 %v585_v25 }
 0x16a   :  { %1025 = vmatprep.subr.bf16.mxu0 %v2091_v5 }
 0x16d   :  { %1026 = vmatpush1.bf16.msra.mxu0 %v2089_v6 }
 0x16e   :  { %1027 = vmatprep.subr.bf16.mxu0 %v2094_v7  ;;  %v2150_v7 = vld [vmem:[%s2517_s4] sm:$0xff]  }
 0x171   :  { %1028 = vmatpush1.bf16.msra.mxu0 %v2092_v8 }
 0x172   :  { %1029 = vmatprep.subr.bf16.mxu0 %v2097_v9  ;;  %v2154_v9 = vld [vmem:[%s2517_s4 + $0x20] sm:$0xff]  }
 0x175   :  { %1030 = vmatpush1.bf16.msra.mxu0 %v2095_v11  ;;  %v2156_v11 = vld [vmem:[%s2517_s4 + $0x30] sm:$0xff]  }
 0x176   :  { %1031 = vmatprep.subr.bf16.mxu0 %v2100_v12  ;;  %v2157_v12 = vld [vmem:[%s2517_s4 + $0x38] sm:$0xff]  }
 0x179   :  { %1032 = vmatpush1.bf16.msra.mxu0 %v2098_v15 }
 0x17a   :  { %1033 = vmatprep.subr.bf16.mxu0 %v2103_v17 }
 0x17d   :  { %1034 = vmatpush1.bf16.msra.mxu0 %v2101_v23  ;;  %v1810_v23 = vld [vmem:[%s2518_s5 + $0x7] ss:$0 sm:$0xff] }
 0x17e   :  { %1035 = vmatprep.subr.bf16.mxu0 %v2106_v24 }
 0x181   :  { %1036 = vmatpush1.bf16.msra.mxu0 %v2104_v26 }
 0x182   :  { %1037 = vmatprep.subr.bf16.mxu0 %v2109_v27 }
 0x185   :  { %1038 = vmatpush1.bf16.msra.mxu0 %v2107_v28 }
 0x186   :  { %1039 = vmatprep.subr.bf16.mxu0 %v2112_v29 }
 0x189   :  { %1040 = vmatpush1.bf16.msra.mxu0 %v2110_v30 }
 0x18a   :  { %1041 = vmatprep.subr.bf16.mxu0 %v2115_v31 }
 0x18d   :  { %1042 = vmatpush1.bf16.msra.mxu0 %v2113_v32 }
 0x18e   :  { %1043 = vmatprep.subr.bf16.mxu0 %v2118_v33 }
 0x191   :  { %1044 = vmatpush1.bf16.msra.mxu0 %v2116_v34 }
 0x192   :  { %1045 = vmatprep.subr.bf16.mxu0 %v2121_v35  ;;  %v1369_v35 = vld [vmem:[%s2520_s7] sm:$0xff] }
 0x195   :  { %1046 = vmatpush1.bf16.msra.mxu0 %v2119_v36  ;;  %v1820_v36 = vcombine.high %v1369_v35, %v1369_v35 }
 0x196   :  { %1047 = vmatprep.subr.bf16.mxu0 %v2124_v37  ;;  %v1819_v37 = vcombine.low %v1369_v35, %v1369_v35 }
 0x199   :  { %1048 = vmatpush1.bf16.msra.mxu0 %v2122_v38  ;;  %v1384_v38 = vsel %vm1382_vm2, %v1819_v37, 0 }
 0x19a   :  { %1049 = vmatprep.subr.bf16.mxu0 %v2127_v40 }
 0x19d   :  { %1050 = vmatpush1.bf16.msra.mxu0 %v2125_v41  ;;  %v2160_v41 = vld [vmem:[%s2520_s7 + $0x8] ss:$0 sps:$4 sm:$0xff]   ;;  %s2312_s7 = smov [#allocation10]  }
 0x19e   :  { %1051 = vmatprep.subr.bf16.mxu0 %v2130_v43  ;;  %v1390_v45 = vsel %vm1382_vm2, %v2160_v41, 0  ;;  %s1654_s13 = sshll.u32 %s2312_s7, 4  ;;  %s1655_s13 = int_to_ptr.vmem [resolvable:$true] %s1654_s13 }
 0x19f   :  { %s2269_s0 = scalar_lea.vmem %s1655_s13, 128  ;;  %p2274_p5 = scmp.lt.s32.totalorder %s1655_s13, %s1655_s13 }
 0x1a0   :  { %p2270_p4 = scmp.ne.s32.totalorder %s1655_s13, %s2269_s0  ;;  %p2275_p6 = scmp.lt.s32.totalorder %s2269_s0, %s2269_s0 }
 0x1a1   :  { %1052 = vmatpush1.bf16.msra.mxu0 %v2128_v44 }
 0x1a2   :  { %1053 = vmatprep.subr.bf16.mxu0 %v2133_v46  ;;  %v2161_v46 = vld [vmem:[#allocation8 + $0x40] sm:$0xff]   ;;  %p2276_p7 = por %p2275_p6, %p2274_p5 }
 0x1a4   :  { %p2277_p8 = pnand %p2276_p7, %p2270_p4 }
 0x1a5   :  { %1054 = vmatpush1.bf16.msra.mxu0 %v2131_v47  ;;  %v2162_v47 = vld [vmem:[#allocation8] sm:$0xff]  }
 0x1a8   :  { %1056 = vmatmul.mubr.bf16.vlgmr.msra.gmra.mrb[4].mxu0 %v584_v49  ;;  %v2164_v49 = vld [vmem:[#allocation8 + $0x8] sm:$0xff]  }
 0x27b   :  { %v1057_v62 = vpop.f32.mrb[4].mxu0 }
 0x27c   :  { %v1922_v63 = vadd.f32 %v1057_v62, %v655_v59  ;;  %v1059_v0 = vpop.f32.mrb[5].mxu0  ;;  %v2170_v59 = vld [vmem:[#allocation8 + $0x20] sm:$0xff]   ;;  %v2173_v62 = vld [vmem:[#allocation8 + $0x70] sm:$0xff]  }
 0x27d   :  { %v1923_v1 = vadd.f32 %v1059_v0, %v659_v61  ;;  %v1061_v2 = vpop.f32.mrb[6].mxu0  ;;  %v2172_v61 = vld [vmem:[#allocation8 + $0x28] sm:$0xff]   ;;  %v2175_v0 = vld [vmem:[#allocation8 + $0x78] sm:$0xff]  }
 0x27e   :  { %v1064_v3 = vmax.f32 %v1922_v63, 0.0  ;;  %v1062_v4 = vpop.f32.mrb[7].mxu0  ;;  %v2174_v63 = vld [vmem:[#allocation8 + $0x30] sm:$0xff]   ;;  %v1473_v2 = vunpack.c.l.bf16 %v2416_v60 }
 0x27f   :  { %v1065_v5 = vmax.f32 %v1923_v1, 0.0  ;;  %v2176_v1 = vld [vmem:[#allocation8 + $0x38] sm:$0xff]  }
 0x280   :  { %v1066_v8 = vpack.c.bf16 %v1064_v3, %v1064_v3  ;;  %v1474_v3 = vunpack.c.l.bf16 %v2409_v18 }
 0x281   :  { %v1067_v6 = vpack.c.bf16 %v1065_v5, %v1065_v5 }
 0x283   :  { %1235 = vmatprep.mubr.bf16.mxu1 %v1067_v6 }
 0x284   :  { %1236 = vmatmul.mubr.bf16.vlgmr.msra.gmra.mrb[4].mxu1 %v1066_v8 }
 0x285   :  { %1897 = vmatpush3.bf16.msra.mxu1 %v2150_v7  ;;  %1912 = vmatprep.mubr.msk.bf16.mxu1 %vm2310_vm0, %v2309_v57 }
 0x286   :  { %1898 = vmatprep.subr.bf16.mxu1 %v2309_v57 }
 0x289   :  { %1899 = vmatpush3.bf16.msra.mxu1 %v2151_v51 }
 0x28a   :  { %1900 = vmatprep.subr.bf16.mxu1 %v2309_v57 }
 0x28d   :  { %1901 = vmatpush3.bf16.msra.mxu1 %v2152_v52 }
 0x28e   :  { %1902 = vmatprep.subr.bf16.mxu1 %v2309_v57 }
 0x291   :  { %1903 = vmatpush3.bf16.msra.mxu1 %v2153_v54 }
 0x292   :  { %1904 = vmatprep.subr.bf16.mxu1 %v2309_v57 }
 0x295   :  { %1905 = vmatpush3.bf16.msra.mxu1 %v2154_v9 }
 0x296   :  { %1906 = vmatprep.subr.bf16.mxu1 %v2309_v57 }
 0x299   :  { %1907 = vmatpush3.bf16.msra.mxu1 %v2155_v10 }
 0x29a   :  { %1908 = vmatprep.subr.bf16.mxu1 %v2309_v57 }
 0x29d   :  { %1909 = vmatpush3.bf16.msra.mxu1 %v2156_v11 }
 0x29e   :  { %1910 = vmatprep.subr.bf16.mxu1 %v2309_v57 }
 0x2a1   :  { %1911 = vmatpush3.bf16.msra.mxu1 %v2157_v12 }
 0x2a2   :  { %1822 = vmatprep.subr.msk.bf16.mxu1 %vm1382_vm2, %v1820_v36 }
 0x357   :  { %v1857_v13 = vpop.f32.mrb[4].mxu1 }
 0x358   :  { %v1858_v15 = vpop.f32.mrb[5].mxu1 }
 0x359   :  { %v1859_v16 = vadd.f32 %v1858_v15, %v1857_v13  ;;  %v1860_v17 = vpop.f32.mrb[6].mxu1 }
 0x35a   :  { %v1861_v19 = vpop.f32.mrb[7].mxu1 }
 0x35b   :  { %v1238_v20 = vadd.f32 %v1859_v16, %v1793_v14 }
 0x35d   :  { %v1243_v21 = vmax.f32 %v1238_v20, 0.0 }
 0x35f   :  { %v1244_v22 = vpack.c.bf16 %v1243_v21, %v1243_v21 }
 0x361   :  { %1913 = vmatmul.mubr.bf16.vlgmr.msra.gmra.mrb[8].mxu1 %v1244_v22 }
 0x362   :  { %1393 = vmatpush1.bf16.msra.mxu1 %v1384_v38  ;;  %1424 = vmatprep.mubr.bf16.mxu1 %v2311_v39 }
 0x363   :  { %1916 = vmatprep.subr.bf16.mxu1 %v2309_v57 }
 0x434   :  { %v1350_v24 = vpop.f32.mrb[8].mxu1 }
 0x435   :  { %v1351_v25 = vadd.f32 %v1810_v23, %v1350_v24  ;;  %v1914_v26 = vpop.f32.mrb[9].mxu1 }
 0x436   :  { %v1353_v27 = vpop.f32.mrb[10].mxu1 }
 0x437   :  { %v1915_v28 = vpop.f32.mrb[11].mxu1  ;;  %v1357_v29 = vsel %vm1356_vm1, %v1351_v25, -inf }
 0x438   :  { %1358 = vmax.xlane.f32.xlu0 %v1357_v29 }
 0x4c5   :  { %v1359_v30 = vpop.xlane.xlu0 %1358 }
 0x4c6   :  { %v1360_v31 = vsub.f32 %v1351_v25, %v1359_v30 }
 0x4c8   :  { %v1361_v32 = vmul.f32 1.442695, %v1360_v31 }
 0x4ca   :  { %2177 = vpow2.f32 %v1361_v32 }
 0x4d4   :  { %v2178_v33 = vpop.eup %2177 }
 0x4d5   :  { %v1363_v34 = vsel %vm1356_vm1, %v2178_v33, 0.0 }
 0x4d6   :  { %1364 = vadd.xlane.f32.xlu0 %v1363_v34 }
 0x563   :  { %v1365_v40 = vpop.xlane.xlu0 %1364 }
 0x564   :  { %2179 = vrcp.f32 %v1365_v40 }
 0x56e   :  { %v2180_v42 = vpop.eup %2179 }
 0x56f   :  { %v1367_v43 = vmul.f32 %v2180_v42, %v2178_v33 }
 0x571   :  { %v1368_v44 = vpack.c.bf16 %v1367_v43, %v1367_v43 }
 0x573   :  { %1823 = vmatmul.mubr.msk.bf16.vlgmr.msra.gmra.mrb[12].mxu1 %vm1356_vm1, %v1368_v44 }
 0x574   :  { %1917 = vmatpush3.bf16.msra.mxu1 %v1390_v45  ;;  %1918 = vmatprep.mubr.msk.bf16.mxu1 %vm2310_vm0, %v2309_v57  ;;  %v2171_v57 = vld [vmem:[#allocation8 + $0x68] sm:$0xff]  }
 0x575   :  { %1874 = vmatprep.subr.bf16.mxu1 %v2161_v46 }
 0x57b   :  { %1919 = vmatmul.mubr.msk.bf16.vlgmr.msra.gmra.mrb[16].mxu1 %vm1356_vm1, %v1368_v44 }
 0x57c   :  { %1875 = vmatpush3.bf16.msra.mxu1 %v2162_v47 }
 0x57d   :  { %1876 = vmatprep.subr.bf16.mxu1 %v2163_v48 }
 0x580   :  { %1877 = vmatpush3.bf16.msra.mxu1 %v2164_v49 }
 0x581   :  { %1878 = vmatprep.subr.bf16.mxu1 %v2165_v50 }
 0x584   :  { %1879 = vmatpush3.bf16.msra.mxu1 %v2166_v55 }
 0x585   :  { %1880 = vmatprep.subr.bf16.mxu1 %v2167_v56 }
 0x588   :  { %1881 = vmatpush3.bf16.msra.mxu1 %v2168_v53 }
 0x589   :  { %1882 = vmatprep.subr.bf16.mxu1 %v2169_v58 }
 0x58c   :  { %1883 = vmatpush3.bf16.msra.mxu1 %v2170_v59 }
 0x58d   :  { %1884 = vmatprep.subr.bf16.mxu1 %v2171_v57 }
 0x590   :  { %1885 = vmatpush3.bf16.msra.mxu1 %v2172_v61 }
 0x591   :  { %1886 = vmatprep.subr.bf16.mxu1 %v2173_v62 }
 0x594   :  { %1887 = vmatpush3.bf16.msra.mxu1 %v2174_v63 }
 0x595   :  { %1888 = vmatprep.subr.bf16.mxu1 %v2175_v0 }
 0x598   :  { %1889 = vmatpush3.bf16.msra.mxu1 %v2176_v1 }
 0x646   :  { %v1426_v4 = vpop.f32.mrb[12].mxu1 }
 0x647   :  { %v1475_v5 = vmul.f32 %v1473_v2, %v1426_v4  ;;  %v1428_v6 = vpop.f32.mrb[13].mxu1 }
 0x648   :  { %v1476_v7 = vmul.f32 %v1474_v3, %v1428_v6  ;;  %v1430_v8 = vpop.f32.mrb[14].mxu1 }
 0x649   :  { %v1431_v51 = vpop.f32.mrb[15].mxu1  ;;  %v1477_v54 = vpack.c.bf16 %v1475_v5, %v1475_v5 }
 0x64a   :  { %v1478_v52 = vpack.c.bf16 %v1476_v7, %v1476_v7 }
 0x64c   :  { %1639 = vmatprep.mubr.bf16.mxu1 %v1478_v52 }
 0x64d   :  { %1640 = vmatmul.mubr.bf16.vlgmr.msra.gmra.mrb[20].mxu1 %v1477_v54 }
 0x64e   :  { %v1467_v9 = vpop.f32.mrb[16].mxu1 }
 0x64f   :  { %v1920_v10 = vpop.f32.mrb[17].mxu1 }
 0x650   :  { %v1470_v11 = vpop.f32.mrb[18].mxu1 }
 0x651   :  { %v1921_v12 = vpop.f32.mrb[19].mxu1 }
 0x720   :  { %v1890_v13 = vpop.f32.mrb[20].mxu1 }
 0x721   :  { %v1891_v14 = vpop.f32.mrb[21].mxu1 }
 0x722   :  { %v1892_v60 = vadd.f32 %v1891_v14, %v1890_v13  ;;  %v1893_v18 = vpop.f32.mrb[22].mxu1 }
 0x723   :  { %v1894_v15 = vpop.f32.mrb[23].mxu1 }
 0x724   :  { %v1642_v16 = vadd.f32 %v1892_v60, %v1467_v9 }
 0x726   :  { %1647 = vst [vmem:[#allocation10] sm:$0xff] %v1642_v16 }
 0x727   :  { %2280 = shalt.err (!%p2277_p8)
}
 0x728   :  { %s2281_s16 = scalar_lea.hbm %s2521_s8, 128 }
 0x729   :  { %p2282_p9 = scmp.ne.s32.totalorder %s2521_s8, %s2281_s16  ;;  %p2285_p10 = scmp.lt.u32.totalorder %s2281_s16, %s2521_s8 }
 0x72b   :  { %p2287_p11 = pnand %p2285_p10, %p2282_p9 }
 0x72d   :  { %2290 = shalt.err (!%p2287_p11)
}
 0x72e   :  { %1657 = dma.vmem_to_hbm [thread:$0]  %s1655_s13, 128, %s2521_s8, [#allocation4]  }
 0x72f   :  { %2297 = dma.done.wait [#allocation4], 128  }
 0x730   :  { %2298 = vsyncadd [#allocation4], 4294967168 }
 0x731   :  { %1661 = vsyncpa [#allocation3], 1 }
 0x732   :  { %1662 = vsyncpa [#allocation6], 1 }
 0x733   :  { %1663 = vsyncpa [#allocation9], 1 }
 0x734   :  { %1664 = vsyncpa [#allocation4], 1 }

</bundles_post_ra>
